<compile_context>
chip_gen: v6e
topology: v6e:2x2x1
jax: 0.10.0
libtpu: 0.0.40
codegen_flags: <defaults>
</compile_context>

<pallas_src>
import jax
import jax.numpy as jnp
from jax import lax
from jax.experimental import pallas as pl
from jax.experimental.pallas import tpu as pltpu

DIM = 512  # hardcoded in the module (self.dim = 512)


def _round_up(x, m):
    return ((x + m - 1) // m) * m


def cnn_attention_kernel(img_ref, w_ref, b_ref, text_ref, out_ref):
    # 1x1 conv == dense: y[r, o] = sum_k img[r, k] * W[o, k] + b[o]
    # bf16 MXU operands, f32 accumulator; W passed as (out, in) -> contract dim 1
    # of both operands (no transposed copy materialized anywhere).
    x = img_ref[...].astype(jnp.bfloat16)
    y = lax.dot_general(
        x, w_ref[...],
        dimension_numbers=(((1,), (1,)), ((), ())),
        preferred_element_type=jnp.float32,
    ) + b_ref[...]

    # attention = softmax(text / 500, axis=-1), per-row, all in f32.
    t = text_ref[...].astype(jnp.float32) * 2e-3          # == / 500
    m = jnp.max(t, axis=-1, keepdims=True)
    e = jnp.exp(t - m)
    inv = pl.reciprocal(jnp.sum(e, axis=-1, keepdims=True), approx=True)
    att = e * inv

    # img + img * att == img * (1 + att)
    out_ref[...] = (y * (1.0 + att)).astype(out_ref.dtype)


def cnn_attention(img, text, w_conv, b_conv, *, tm=1024):
    """img: (N, DIM, 1, 1) or (N, DIM); text: (..., DIM);
    w_conv: (DIM, DIM, 1, 1); b_conv: (DIM,). Returns (N, DIM) float32."""
    img2d = img.reshape(-1, DIM)            # view(-1, dim)
    text2d = text.reshape(-1, DIM)          # view(-1, dim)
    n = img2d.shape[0]

    # Row tile: big enough to amortize per-step overhead, clipped for tiny batches.
    tm = min(tm, _round_up(n, 8))
    grid = (pl.cdiv(n, tm),)

    w = w_conv.reshape(DIM, DIM).astype(jnp.bfloat16)   # (out, in); no .T
    b = b_conv.reshape(1, DIM).astype(jnp.float32)

    cost = pl.CostEstimate(
        flops=2 * n * DIM * DIM,                 # matmul
        transcendentals=n * DIM + n,             # exp + reciprocal
        bytes_accessed=3 * n * DIM * 4 + DIM * DIM * 2 + DIM * 4,
    )

    out = pl.pallas_call(
        cnn_attention_kernel,
        out_shape=jax.ShapeDtypeStruct((n, DIM), jnp.float32),
        grid_spec=pltpu.PrefetchScalarGridSpec(
            num_scalar_prefetch=0,
            grid=grid,
            in_specs=[
                pl.BlockSpec((tm, DIM), lambda i: (i, 0)),     # img tile
                pl.BlockSpec((DIM, DIM), lambda i: (0, 0)),    # W (out, in), resident
                pl.BlockSpec((1, DIM), lambda i: (0, 0)),      # bias, resident
                pl.BlockSpec((tm, DIM), lambda i: (i, 0)),     # text tile
            ],
            out_specs=pl.BlockSpec((tm, DIM), lambda i: (i, 0)),
        ),
        compiler_params=pltpu.CompilerParams(
            dimension_semantics=("parallel",),    # megacore-shardable row tiles
        ),
        cost_estimate=cost,
    )(img2d, w, b, text2d)
    return out


def reference(img, text, w_conv, b_conv):
    img2d = img.reshape(-1, DIM).astype(jnp.float32)
    y = img2d @ w_conv.reshape(DIM, DIM).T.astype(jnp.float32) + b_conv[None, :]
    att = jax.nn.softmax(text.reshape(-1, DIM).astype(jnp.float32) / 500.0, axis=-1)
    return y + y * att


if __name__ == "__main__":
    key = jax.random.PRNGKey(0)
    k1, k2, k3, k4 = jax.random.split(key, 4)

    # Deterministic "Conv2d(512, 512, 1)" parameters (synthetic init).
    fan_in = DIM
    bound = 1.0 / jnp.sqrt(fan_in)
    w_conv = jax.random.uniform(k3, (DIM, DIM, 1, 1), jnp.float32, -bound, bound)
    b_conv = jax.random.uniform(k4, (DIM,), jnp.float32, -bound, bound)

    # Case 1: small batch, module-shaped NCHW input, default tile (single block).
    batch = 8
    img = jax.random.normal(k1, (batch, DIM, 1, 1), dtype=jnp.float32)
    text = jax.random.normal(k2, (batch, DIM), dtype=jnp.float32)
    out = jax.block_until_ready(cnn_attention(img, text, w_conv, b_conv))
    ref = reference(img, text, w_conv, b_conv)
    assert out.shape == (batch, DIM)
    # bf16 MXU operands -> tolerance relaxed vs pure-f32 reference.
    assert jnp.allclose(out, ref, atol=2e-2, rtol=2e-2), "mismatch vs reference (case 1)"

    # Case 2: exercise the row-tiled pipeline (grid > 1) and last-block padding
    # (20 rows, tile of 8 -> 3 grid steps, last block half-padded).
    batch2 = 20
    img2 = jax.random.normal(k1, (batch2, DIM, 1, 1), dtype=jnp.float32)
    text2 = jax.random.normal(k2, (batch2, DIM), dtype=jnp.float32)
    out2 = jax.block_until_ready(cnn_attention(img2, text2, w_conv, b_conv, tm=8))
    ref2 = reference(img2, text2, w_conv, b_conv)
    assert out2.shape == (batch2, DIM)
    assert jnp.allclose(out2, ref2, atol=2e-2, rtol=2e-2), "mismatch vs reference (case 2)"

    print("KERNEL_OK")
</pallas_src>

<mosaic_0001>
module attributes {stable_mosaic.version = 11 : i64} {
  func.func @cnn_attention_kernel(%arg0: i32, %arg1: memref<8x512xf32, #tpu.memory_space<vmem>>, %arg2: memref<512x512xbf16, #tpu.memory_space<vmem>>, %arg3: memref<1x512xf32, #tpu.memory_space<vmem>>, %arg4: memref<8x512xf32, #tpu.memory_space<vmem>>, %arg5: memref<8x512xf32, #tpu.memory_space<vmem>>) attributes {dimension_semantics = [#tpu.dimension_semantics<parallel>], iteration_bounds = array<i64: 1>, scalar_prefetch = 0 : i64, scratch_operands = 0 : i64, tpu.core_type = #tpu.core_type<tc>, window_params = [{transform_indices = @transform_0, window_bounds = array<i64: 8, 512>}, {pipeline_mode = #tpu.pipeline_mode<synchronous>, transform_indices = @transform_1, window_bounds = array<i64: 512, 512>}, {pipeline_mode = #tpu.pipeline_mode<synchronous>, transform_indices = @transform_2, window_bounds = array<i64: 1, 512>}, {transform_indices = @transform_3, window_bounds = array<i64: 8, 512>}, {transform_indices = @transform_4, window_bounds = array<i64: 8, 512>}]} {
    %c0 = arith.constant 0 : index
    %c0_0 = arith.constant 0 : index
    %0 = vector.load %arg1[%c0, %c0_0] : memref<8x512xf32, #tpu.memory_space<vmem>>, vector<8x512xf32>
    %1 = arith.truncf %0 : vector<8x512xf32> to vector<8x512xbf16>
    %c0_1 = arith.constant 0 : index
    %c0_2 = arith.constant 0 : index
    %2 = vector.load %arg2[%c0_1, %c0_2] : memref<512x512xbf16, #tpu.memory_space<vmem>>, vector<512x512xbf16>
    %cst = arith.constant dense<0.000000e+00> : vector<8x512xf32>
    %3 = tpu.matmul %1, %2, %cst {dimension_numbers = #tpu.dot_dimension_numbers<[1], [1], [0], [0], [0, 0, 1, 0], [], []>} : vector<8x512xbf16>, vector<512x512xbf16>, vector<8x512xf32> -> vector<8x512xf32>
    %c0_3 = arith.constant 0 : index
    %c0_4 = arith.constant 0 : index
    %4 = vector.load %arg3[%c0_3, %c0_4] : memref<1x512xf32, #tpu.memory_space<vmem>>, vector<1x512xf32>
    %5 = vector.broadcast %4 : vector<1x512xf32> to vector<8x512xf32>
    %6 = arith.addf %3, %5 : vector<8x512xf32>
    %c0_5 = arith.constant 0 : index
    %c0_6 = arith.constant 0 : index
    %7 = vector.load %arg4[%c0_5, %c0_6] : memref<8x512xf32, #tpu.memory_space<vmem>>, vector<8x512xf32>
    %cst_7 = arith.constant 2.000000e-03 : f32
    %8 = vector.broadcast %cst_7 : f32 to vector<8x512xf32>
    %9 = arith.mulf %7, %8 : vector<8x512xf32>
    %cst_8 = arith.constant dense<0xFF800000> : vector<8xf32>
    %10 = vector.multi_reduction <maximumf>, %9, %cst_8 [1] : vector<8x512xf32> to vector<8xf32>
    %11 = vector.shape_cast %10 : vector<8xf32> to vector<8x1xf32>
    %12 = vector.broadcast %11 : vector<8x1xf32> to vector<8x512xf32>
    %13 = arith.subf %9, %12 : vector<8x512xf32>
    %14 = math.exp %13 : vector<8x512xf32>
    %cst_9 = arith.constant dense<0.000000e+00> : vector<8xf32>
    %15 = vector.multi_reduction <add>, %14, %cst_9 [1] : vector<8x512xf32> to vector<8xf32>
    %16 = vector.shape_cast %15 : vector<8xf32> to vector<8x1xf32>
    %17 = tpu.reciprocal %16 {approx = true} : vector<8x1xf32> -> vector<8x1xf32>
    %18 = vector.broadcast %17 : vector<8x1xf32> to vector<8x512xf32>
    %19 = arith.mulf %14, %18 : vector<8x512xf32>
    %cst_10 = arith.constant 1.000000e+00 : f32
    %20 = vector.broadcast %cst_10 : f32 to vector<8x512xf32>
    %21 = arith.addf %20, %19 : vector<8x512xf32>
    %22 = arith.mulf %6, %21 : vector<8x512xf32>
    %c0_11 = arith.constant 0 : index
    %c0_12 = arith.constant 0 : index
    %23 = vector.load %arg5[%c0_11, %c0_12] : memref<8x512xf32, #tpu.memory_space<vmem>>, vector<8x512xf32>
    tpu.vector_store %arg5[%c0_11, %c0_12], %22 {strides = array<i32>} : memref<8x512xf32, #tpu.memory_space<vmem>>, vector<8x512xf32>,
    return
  }
  func.func @transform_0(%arg0: i32) -> (i32, i32) {
    %c0_i32 = arith.constant 0 : i32
    %c0_i32_0 = arith.constant 0 : i32
    return %arg0, %c0_i32 : i32, i32
  }
  func.func @transform_1(%arg0: i32) -> (i32, i32) {
    %c0_i32 = arith.constant 0 : i32
    %c0_i32_0 = arith.constant 0 : i32
    %c0_i32_1 = arith.constant 0 : i32
    return %c0_i32, %c0_i32_0 : i32, i32
  }
  func.func @transform_2(%arg0: i32) -> (i32, i32) {
    %c0_i32 = arith.constant 0 : i32
    %c0_i32_0 = arith.constant 0 : i32
    %c0_i32_1 = arith.constant 0 : i32
    return %c0_i32, %c0_i32_0 : i32, i32
  }
  func.func @transform_3(%arg0: i32) -> (i32, i32) {
    %c0_i32 = arith.constant 0 : i32
    %c0_i32_0 = arith.constant 0 : i32
    return %arg0, %c0_i32 : i32, i32
  }
  func.func @transform_4(%arg0: i32) -> (i32, i32) {
    %c0_i32 = arith.constant 0 : i32
    %c0_i32_0 = arith.constant 0 : i32
    return %arg0, %c0_i32 : i32, i32
  }
}

</mosaic_0001>

<bundles_post_ra>
// kernel: tpu_custom_call.1
= control target key start
LH: loop header
LB: loop body
LE: loop exit
PB: predicated region body
PF: predicated region fallthrough
CT: control target
= control target key end

     0   :  { %9 = vsyncpa [#allocation3], 0  ;;  %s1633_s0 = inlined_call_operand.hbm [shape: f32[8,512], index: 0, kind: input, shape index: {}]   ;;  %s1634_s1 = inlined_call_operand.hbm [shape: bf16[512,512], index: 1, kind: input, shape index: {}]   ;;  %s1635_s2 = inlined_call_operand.hbm [shape: f32[1,512], index: 2, kind: input, shape index: {}]   ;;  %s1636_s3 = inlined_call_operand.hbm [shape: f32[8,512], index: 3, kind: input, shape index: {}]   ;;  %s1637_s4 = inlined_call_operand.hbm [shape: f32[8,512], index: 4, kind: output, shape index: {}]  }
   0x1   :  { %10 = vsyncpa [#allocation6], 0 }
   0x2   :  { %11 = vsyncpa [#allocation9], 0 }
   0x3   :  { %12 = vsyncpa [#allocation4], 0  ;;  %s1538_s15 = smov [#allocation5]  }
   0x4   :  { %s28_s16 = sshll.u32 %s1538_s15, 4  ;;  %s29_s16 = int_to_ptr.vmem [resolvable:$true] %s28_s16 }
   0x5   :  { %s1438_s17 = scalar_lea.vmem %s29_s16, 16384  ;;  %p1443_p1 = scmp.lt.s32.totalorder %s29_s16, %s29_s16 }
   0x6   :  { %p1439_p0 = scmp.ne.s32.totalorder %s29_s16, %s1438_s17  ;;  %p1444_p2 = scmp.lt.s32.totalorder %s1438_s17, %s1438_s17 }
   0x8   :  { %p1445_p3 = por %p1444_p2, %p1443_p1 }
   0xa   :  { %p1446_p4 = pnand %p1445_p3, %p1439_p0 }
   0xc   :  { %1449 = shalt.err (!%p1446_p4)
}
   0xd   :  { %s1539_s18 = smov 256   ;;  %s1540_s19 = smov 16  }
   0xe   :  { %34 = dma.hbm_to_vmem [thread:$0]  %s1634_s1, 16384, %s29_s16, [#allocation6], %s1539_s18, %s1539_s18, %s1540_s19  }
   0xf   :  { %s1541_s22 = smov [#allocation2]   ;;  %s1542_s24 = smov [#allocation7]  }
  0x10   :  { %s19_s23 = sshll.u32 %s1541_s22, 4  ;;  %s41_s25 = sshll.u32 %s1542_s24, 4  ;;  %s20_s23 = int_to_ptr.vmem [resolvable:$true] %s19_s23  ;;  %s42_s25 = int_to_ptr.vmem [resolvable:$true] %s41_s25 }
  0x11   :  { %s1458_s26 = scalar_lea.vmem %s20_s23, 512  ;;  %p1463_p6 = scmp.lt.s32.totalorder %s20_s23, %s20_s23 }
  0x12   :  { %p1459_p5 = scmp.ne.s32.totalorder %s20_s23, %s1458_s26  ;;  %p1464_p7 = scmp.lt.s32.totalorder %s1458_s26, %s1458_s26 }
  0x14   :  { %p1465_p8 = por %p1464_p7, %p1463_p6 }
  0x16   :  { %p1466_p9 = pnand %p1465_p8, %p1459_p5 }
  0x18   :  { %1469 = shalt.err (!%p1466_p9)
}
  0x19   :  { %22 = dma.hbm_to_vmem [thread:$0]  %s1633_s0, 512, %s20_s23, [#allocation3]  }
  0x1a   :  { %s1478_s29 = scalar_lea.vmem %s42_s25, 64  ;;  %p1483_p11 = scmp.lt.s32.totalorder %s42_s25, %s42_s25 }
  0x1b   :  { %p1479_p10 = scmp.ne.s32.totalorder %s42_s25, %s1478_s29  ;;  %p1484_p12 = scmp.lt.s32.totalorder %s1478_s29, %s1478_s29 }
  0x1d   :  { %p1485_p13 = por %p1484_p12, %p1483_p11 }
  0x1f   :  { %p1486_p0 = pnand %p1485_p13, %p1479_p10 }
  0x21   :  { %1489 = shalt.err (!%p1486_p0)
}
  0x22   :  { %44 = dma.hbm_to_vmem [thread:$0]  %s1635_s2, 64, %s42_s25, [#allocation6]  }
  0x23   :  { %s1543_s5 = smov [#allocation8]  }
  0x24   :  { %s51_s6 = sshll.u32 %s1543_s5, 4  ;;  %s52_s6 = int_to_ptr.vmem [resolvable:$true] %s51_s6 }
  0x25   :  { %s1498_s7 = scalar_lea.vmem %s52_s6, 512  ;;  %p1503_p2 = scmp.lt.s32.totalorder %s52_s6, %s52_s6 }
  0x26   :  { %p1499_p1 = scmp.ne.s32.totalorder %s52_s6, %s1498_s7  ;;  %p1504_p3 = scmp.lt.s32.totalorder %s1498_s7, %s1498_s7 }
  0x28   :  { %p1505_p4 = por %p1504_p3, %p1503_p2 }
  0x2a   :  { %p1506_p5 = pnand %p1505_p4, %p1499_p1 }
  0x2c   :  { %1509 = shalt.err (!%p1506_p5)
}
  0x2d   :  { %54 = dma.hbm_to_vmem [thread:$0]  %s1636_s3, 512, %s52_s6, [#allocation9]  }
  0x2e   :  { %1530 = dma.done.wait [#allocation3], 512  }
  0x2f   :  { %1531 = vsyncadd [#allocation3], 4294966784 }
  0x30   :  { %1532 = dma.done.wait [#allocation6], 16448  }
  0x31   :  { %1533 = vsyncadd [#allocation6], 4294950848 }
  0x32   :  { %1534 = dma.done.wait [#allocation9], 512  }
  0x33   :  { %1535 = vsyncadd [#allocation9], 4294966784  ;;  %v1228_v0 = vld [vmem:[#allocation5 + $0xe4] ss:$16 sps:$4 sm:$0xff]   ;;  %v1230_v1 = vld [vmem:[#allocation5 + $0xec] ss:$16 sps:$4 sm:$0xff]  }
  0x34   :  { %865 = vmatprep.subr.bf16.mxu0 %v1228_v0  ;;  %v1232_v2 = vld [vmem:[#allocation5 + $0xe0] ss:$16 sps:$4 sm:$0xff]   ;;  %v1233_v3 = vld [vmem:[#allocation5 + $0xe8] ss:$16 sps:$4 sm:$0xff]   ;;  %906 = vmatprep.subr.bf16.mxu1 %v1230_v1  ;;  %v1234_v12 = vld [vmem:[#allocation5 + $0xc4] ss:$16 sps:$4 sm:$0xff]  }
  0x35   :  { %v1029_v4 = vld [vmem:[#allocation8] sm:$0xff]  ;;  %v1030_v5 = vld [vmem:[#allocation8 + $0x8] sm:$0xff]  ;;  %v1031_v6 = vld [vmem:[#allocation8 + $0x10] sm:$0xff]  ;;  %866 = vmatpush1.bf16.xpose.msra.mxu0 %v1232_v2  ;;  %907 = vmatpush1.bf16.xpose.msra.mxu1 %v1233_v3  ;;  %s1544_s2 = smov [#allocation10]  }
  0x36   :  { %v1032_v7 = vld [vmem:[#allocation8 + $0x18] sm:$0xff]  ;;  %v1582_v8 = vmul.f32 0.002, %v1029_v4  ;;  %v1584_v9 = vmul.f32 0.002, %v1030_v5  ;;  %867 = vmatprep.subr.bf16.mxu0 %v1234_v12  ;;  %v68_v37 = vld [vmem:[#allocation2 + $0x8] sm:$0xff] }
  0x37   :  { %v1586_v10 = vmul.f32 0.002, %v1031_v6  ;;  %v1588_v11 = vmul.f32 0.002, %v1032_v7  ;;  %v1236_v15 = vld [vmem:[#allocation5 + $0xcc] ss:$16 sps:$4 sm:$0xff]   ;;  %v1594_v39 = vpack.c.bf16 %v68_v37, %v68_v37 }
  0x38   :  { %v1037_v13 = vmax.f32 %v1582_v8, %v1584_v9  ;;  %v1238_v16 = vld [vmem:[#allocation5 + $0xc0] ss:$16 sps:$4 sm:$0xff]   ;;  %908 = vmatprep.subr.bf16.mxu1 %v1236_v15  ;;  %v1239_v18 = vld [vmem:[#allocation5 + $0xc8] ss:$16 sps:$4 sm:$0xff]   ;;  %v1240_v19 = vld [vmem:[#allocation5 + $0xa4] ss:$16 sps:$4 sm:$0xff]  }
  0x39   :  { %v1038_v14 = vmax.f32 %v1586_v10, %v1588_v11  ;;  %v1242_v20 = vld [vmem:[#allocation5 + $0xac] ss:$16 sps:$4 sm:$0xff]   ;;  %v1244_v21 = vld [vmem:[#allocation5 + $0xa0] ss:$16 sps:$4 sm:$0xff]   ;;  %v1245_v22 = vld [vmem:[#allocation5 + $0xa8] ss:$16 sps:$4 sm:$0xff]   ;;  %897 = vmatprep.mubr.bf16.mxu0 %v1594_v39 }
  0x3a   :  { %v1246_v23 = vld [vmem:[#allocation5 + $0x84] ss:$16 sps:$4 sm:$0xff]   ;;  %v1248_v24 = vld [vmem:[#allocation5 + $0x8c] ss:$16 sps:$4 sm:$0xff]   ;;  %v1250_v25 = vld [vmem:[#allocation5 + $0x80] ss:$16 sps:$4 sm:$0xff]  }
  0x3b   :  { %v1039_v17 = vmax.f32 %v1037_v13, %v1038_v14  ;;  %v1251_v26 = vld [vmem:[#allocation5 + $0x88] ss:$16 sps:$4 sm:$0xff]   ;;  %v1252_v27 = vld [vmem:[#allocation5 + $0x64] ss:$16 sps:$4 sm:$0xff]   ;;  %v1254_v28 = vld [vmem:[#allocation5 + $0x6c] ss:$16 sps:$4 sm:$0xff]  }
  0x3c   :  { %v1256_v29 = vld [vmem:[#allocation5 + $0x60] ss:$16 sps:$4 sm:$0xff]   ;;  %v1257_v30 = vld [vmem:[#allocation5 + $0x68] ss:$16 sps:$4 sm:$0xff]   ;;  %v1258_v31 = vld [vmem:[#allocation5 + $0x44] ss:$16 sps:$4 sm:$0xff]  }
  0x3d   :  { %1040 = vmax.xlane.f32.xlu0 %v1039_v17  ;;  %868 = vmatpush1.bf16.xpose.msra.mxu0 %v1238_v16  ;;  %v1260_v32 = vld [vmem:[#allocation5 + $0x4c] ss:$16 sps:$4 sm:$0xff]   ;;  %v1262_v33 = vld [vmem:[#allocation5 + $0x40] ss:$16 sps:$4 sm:$0xff]   ;;  %v1263_v34 = vld [vmem:[#allocation5 + $0x48] ss:$16 sps:$4 sm:$0xff]  }
  0x3e   :  { %909 = vmatpush1.bf16.xpose.msra.mxu1 %v1239_v18  ;;  %869 = vmatprep.subr.bf16.mxu0 %v1240_v19  ;;  %v1264_v35 = vld [vmem:[#allocation5 + $0x24] ss:$16 sps:$4 sm:$0xff]   ;;  %v1266_v36 = vld [vmem:[#allocation5 + $0x2c] ss:$16 sps:$4 sm:$0xff]   ;;  %v1268_v41 = vld [vmem:[#allocation5 + $0x20] ss:$16 sps:$4 sm:$0xff]  }
  0x3f   :  { %910 = vmatprep.subr.bf16.mxu1 %v1242_v20  ;;  %v70_v38 = vld [vmem:[#allocation2 + $0x18] sm:$0xff]  ;;  %v1270_v43 = vld [vmem:[#allocation5 + $0x4] ss:$16 sps:$4 sm:$0xff]   ;;  %v1274_v45 = vld [vmem:[#allocation5] ss:$16 sps:$4 sm:$0xff]   ;;  %s1082_s3 = sshll.u32 %s1544_s2, 4  ;;  %s1083_s3 = int_to_ptr.vmem [resolvable:$true] %s1082_s3 }
  0x40   :  { %v1596_v40 = vpack.c.bf16 %v70_v38, %v70_v38  ;;  %v1269_v42 = vld [vmem:[#allocation5 + $0x28] ss:$16 sps:$4 sm:$0xff]   ;;  %v1272_v44 = vld [vmem:[#allocation5 + $0xc] ss:$16 sps:$4 sm:$0xff]   ;;  %v1276_v47 = vld [vmem:[#allocation5 + $0x1e4] ss:$16 sps:$4 sm:$0xff]   ;;  %p1515_p7 = scmp.lt.s32.totalorder %s1083_s3, %s1083_s3 }
  0x41   :  { %v1275_v46 = vld [vmem:[#allocation5 + $0x8] ss:$16 sps:$4 sm:$0xff]   ;;  %v1278_v48 = vld [vmem:[#allocation5 + $0x1ec] ss:$16 sps:$4 sm:$0xff]   ;;  %v1280_v49 = vld [vmem:[#allocation5 + $0x1e0] ss:$16 sps:$4 sm:$0xff]  }
  0x42   :  { %938 = vmatprep.mubr.bf16.mxu1 %v1596_v40  ;;  %v1281_v50 = vld [vmem:[#allocation5 + $0x1e8] ss:$16 sps:$4 sm:$0xff]   ;;  %v1282_v51 = vld [vmem:[#allocation5 + $0x1c4] ss:$16 sps:$4 sm:$0xff]   ;;  %v1284_v52 = vld [vmem:[#allocation5 + $0x1cc] ss:$16 sps:$4 sm:$0xff]  }
  0x43   :  { %v1286_v53 = vld [vmem:[#allocation5 + $0x1c0] ss:$16 sps:$4 sm:$0xff]   ;;  %v1287_v54 = vld [vmem:[#allocation5 + $0x1c8] ss:$16 sps:$4 sm:$0xff]   ;;  %v1288_v55 = vld [vmem:[#allocation5 + $0x1a4] ss:$16 sps:$4 sm:$0xff]  }
  0x44   :  { %v1290_v56 = vld [vmem:[#allocation5 + $0x1ac] ss:$16 sps:$4 sm:$0xff]   ;;  %v1292_v57 = vld [vmem:[#allocation5 + $0x1a0] ss:$16 sps:$4 sm:$0xff]   ;;  %v1293_v58 = vld [vmem:[#allocation5 + $0x1a8] ss:$16 sps:$4 sm:$0xff]  }
  0x45   :  { %870 = vmatpush1.bf16.xpose.msra.mxu0 %v1244_v21  ;;  %v1294_v59 = vld [vmem:[#allocation5 + $0x184] ss:$16 sps:$4 sm:$0xff]   ;;  %v1296_v60 = vld [vmem:[#allocation5 + $0x18c] ss:$16 sps:$4 sm:$0xff]   ;;  %v1298_v61 = vld [vmem:[#allocation5 + $0x180] ss:$16 sps:$4 sm:$0xff]  }
  0x46   :  { %911 = vmatpush1.bf16.xpose.msra.mxu1 %v1245_v22  ;;  %871 = vmatprep.subr.bf16.mxu0 %v1246_v23  ;;  %v1299_v62 = vld [vmem:[#allocation5 + $0x188] ss:$16 sps:$4 sm:$0xff]   ;;  %v1300_v63 = vld [vmem:[#allocation5 + $0x164] ss:$16 sps:$4 sm:$0xff]   ;;  %v1302_v0 = vld [vmem:[#allocation5 + $0x16c] ss:$16 sps:$4 sm:$0xff]  }
  0x47   :  { %912 = vmatprep.subr.bf16.mxu1 %v1248_v24  ;;  %v1304_v1 = vld [vmem:[#allocation5 + $0x160] ss:$16 sps:$4 sm:$0xff]   ;;  %v1305_v2 = vld [vmem:[#allocation5 + $0x168] ss:$16 sps:$4 sm:$0xff]   ;;  %v1306_v3 = vld [vmem:[#allocation5 + $0x144] ss:$16 sps:$4 sm:$0xff]  }
  0x48   :  { %v1308_v4 = vld [vmem:[#allocation5 + $0x14c] ss:$16 sps:$4 sm:$0xff]   ;;  %v1310_v5 = vld [vmem:[#allocation5 + $0x140] ss:$16 sps:$4 sm:$0xff]   ;;  %v1311_v6 = vld [vmem:[#allocation5 + $0x148] ss:$16 sps:$4 sm:$0xff]  }
  0x49   :  { %v1312_v7 = vld [vmem:[#allocation5 + $0x124] ss:$16 sps:$4 sm:$0xff]   ;;  %v1314_v12 = vld [vmem:[#allocation5 + $0x12c] ss:$16 sps:$4 sm:$0xff]   ;;  %v1316_v13 = vld [vmem:[#allocation5 + $0x120] ss:$16 sps:$4 sm:$0xff]  }
  0x4a   :  { %v1317_v14 = vld [vmem:[#allocation5 + $0x128] ss:$16 sps:$4 sm:$0xff]   ;;  %v1318_v15 = vld [vmem:[#allocation5 + $0x104] ss:$16 sps:$4 sm:$0xff]   ;;  %v1320_v16 = vld [vmem:[#allocation5 + $0x10c] ss:$16 sps:$4 sm:$0xff]  }
  0x4b   :  { %v1322_v17 = vld [vmem:[#allocation5 + $0x100] ss:$16 sps:$4 sm:$0xff]   ;;  %v1323_v18 = vld [vmem:[#allocation5 + $0x108] ss:$16 sps:$4 sm:$0xff]   ;;  %v1326_v19 = vld [vmem:[#allocation5 + $0x2e4] ss:$16 sps:$4 sm:$0xff]  }
  0x4c   :  { %v1329_v20 = vld [vmem:[#allocation5 + $0x2ec] ss:$16 sps:$4 sm:$0xff]   ;;  %v67_v21 = vld [vmem:[#allocation2] sm:$0xff]  ;;  %v69_v22 = vld [vmem:[#allocation2 + $0x10] sm:$0xff]  ;;  %s1510_s9 = scalar_lea.vmem %s1083_s3, 512 }
  0x4d   :  { %872 = vmatpush1.bf16.xpose.msra.mxu0 %v1250_v25  ;;  %v1600_v23 = vpack.c.bf16 %v67_v21, %v67_v21  ;;  %v1602_v24 = vpack.c.bf16 %v69_v22, %v69_v22  ;;  %v1324_v25 = vld [vmem:[#allocation5 + $0x2e0] ss:$16 sps:$4 sm:$0xff]   ;;  %v1393_v22 = vld [vmem:[#allocation5 + $0x388] ss:$16 sps:$4 sm:$0xff]   ;;  %p1511_p6 = scmp.ne.s32.totalorder %s1083_s3, %s1510_s9  ;;  %p1516_p8 = scmp.lt.s32.totalorder %s1510_s9, %s1510_s9 }
  0x4e   :  { %913 = vmatpush1.bf16.xpose.msra.mxu1 %v1251_v26  ;;  %873 = vmatprep.subr.bf16.mxu0 %v1252_v27  ;;  %v1327_v26 = vld [vmem:[#allocation5 + $0x2e8] ss:$16 sps:$4 sm:$0xff]   ;;  %v1332_v27 = vld [vmem:[#allocation5 + $0x2c4] ss:$16 sps:$4 sm:$0xff]   ;;  %v1390_v21 = vld [vmem:[#allocation5 + $0x380] ss:$16 sps:$4 sm:$0xff]  }
  0x4f   :  { %914 = vmatprep.subr.bf16.mxu1 %v1254_v28  ;;  %v1335_v28 = vld [vmem:[#allocation5 + $0x2cc] ss:$16 sps:$4 sm:$0xff]   ;;  %p1517_p9 = por %p1516_p8, %p1515_p7 }
  0x51   :  { %p1518_p10 = pnand %p1517_p9, %p1511_p6 }
  0x55   :  { %874 = vmatpush1.bf16.xpose.msra.mxu0 %v1256_v29  ;;  %v1330_v29 = vld [vmem:[#allocation5 + $0x2c0] ss:$16 sps:$4 sm:$0xff]  }
  0x56   :  { %915 = vmatpush1.bf16.xpose.msra.mxu1 %v1257_v30  ;;  %875 = vmatprep.subr.bf16.mxu0 %v1258_v31  ;;  %v1333_v30 = vld [vmem:[#allocation5 + $0x2c8] ss:$16 sps:$4 sm:$0xff]   ;;  %v1338_v31 = vld [vmem:[#allocation5 + $0x2a4] ss:$16 sps:$4 sm:$0xff]  }
  0x57   :  { %916 = vmatprep.subr.bf16.mxu1 %v1260_v32  ;;  %v1341_v32 = vld [vmem:[#allocation5 + $0x2ac] ss:$16 sps:$4 sm:$0xff]  }
  0x5d   :  { %876 = vmatpush1.bf16.xpose.msra.mxu0 %v1262_v33  ;;  %v1336_v33 = vld [vmem:[#allocation5 + $0x2a0] ss:$16 sps:$4 sm:$0xff]  }
  0x5e   :  { %917 = vmatpush1.bf16.xpose.msra.mxu1 %v1263_v34  ;;  %877 = vmatprep.subr.bf16.mxu0 %v1264_v35  ;;  %v1339_v34 = vld [vmem:[#allocation5 + $0x2a8] ss:$16 sps:$4 sm:$0xff]   ;;  %v1344_v35 = vld [vmem:[#allocation5 + $0x284] ss:$16 sps:$4 sm:$0xff]  }
  0x5f   :  { %918 = vmatprep.subr.bf16.mxu1 %v1266_v36  ;;  %v1347_v36 = vld [vmem:[#allocation5 + $0x28c] ss:$16 sps:$4 sm:$0xff]  }
  0x65   :  { %878 = vmatpush1.bf16.xpose.msra.mxu0 %v1268_v41 }
  0x66   :  { %919 = vmatpush1.bf16.xpose.msra.mxu1 %v1269_v42  ;;  %879 = vmatprep.subr.bf16.mxu0 %v1270_v43 }
  0x67   :  { %920 = vmatprep.subr.bf16.mxu1 %v1272_v44 }
  0x6d   :  { %880 = vmatpush1.bf16.xpose.msra.mxu0 %v1274_v45 }
  0x6e   :  { %921 = vmatpush1.bf16.xpose.msra.mxu1 %v1275_v46  ;;  %881 = vmatprep.subr.bf16.mxu0 %v1276_v47  ;;  %v1342_v46 = vld [vmem:[#allocation5 + $0x280] ss:$16 sps:$4 sm:$0xff]   ;;  %v1345_v47 = vld [vmem:[#allocation5 + $0x288] ss:$16 sps:$4 sm:$0xff]  }
  0x6f   :  { %922 = vmatprep.subr.bf16.mxu1 %v1278_v48  ;;  %v1350_v48 = vld [vmem:[#allocation5 + $0x264] ss:$16 sps:$4 sm:$0xff]  }
  0x75   :  { %882 = vmatpush2.bf16.xpose.msra.mxu0 %v1280_v49  ;;  %v1359_v49 = vld [vmem:[#allocation5 + $0x24c] ss:$16 sps:$4 sm:$0xff]  }
  0x76   :  { %923 = vmatpush2.bf16.xpose.msra.mxu1 %v1281_v50  ;;  %883 = vmatprep.subr.bf16.mxu0 %v1282_v51 }
  0x77   :  { %924 = vmatprep.subr.bf16.mxu1 %v1284_v52 }
  0x7d   :  { %884 = vmatpush2.bf16.xpose.msra.mxu0 %v1286_v53 }
  0x7e   :  { %925 = vmatpush2.bf16.xpose.msra.mxu1 %v1287_v54  ;;  %885 = vmatprep.subr.bf16.mxu0 %v1288_v55  ;;  %v1354_v55 = vld [vmem:[#allocation5 + $0x240] ss:$16 sps:$4 sm:$0xff]  }
  0x7f   :  { %926 = vmatprep.subr.bf16.mxu1 %v1290_v56 }
  0x85   :  { %886 = vmatpush2.bf16.xpose.msra.mxu0 %v1292_v57  ;;  %v1357_v57 = vld [vmem:[#allocation5 + $0x248] ss:$16 sps:$4 sm:$0xff]  }
  0x86   :  { %927 = vmatpush2.bf16.xpose.msra.mxu1 %v1293_v58  ;;  %887 = vmatprep.subr.bf16.mxu0 %v1294_v59  ;;  %v1362_v58 = vld [vmem:[#allocation5 + $0x224] ss:$16 sps:$4 sm:$0xff]   ;;  %v1365_v59 = vld [vmem:[#allocation5 + $0x22c] ss:$16 sps:$4 sm:$0xff]  }
  0x87   :  { %928 = vmatprep.subr.bf16.mxu1 %v1296_v60 }
  0x8d   :  { %888 = vmatpush2.bf16.xpose.msra.mxu0 %v1298_v61  ;;  %v1360_v61 = vld [vmem:[#allocation5 + $0x220] ss:$16 sps:$4 sm:$0xff]  }
  0x8e   :  { %929 = vmatpush2.bf16.xpose.msra.mxu1 %v1299_v62  ;;  %889 = vmatprep.subr.bf16.mxu0 %v1300_v63  ;;  %v1363_v62 = vld [vmem:[#allocation5 + $0x228] ss:$16 sps:$4 sm:$0xff]   ;;  %v1368_v63 = vld [vmem:[#allocation5 + $0x204] ss:$16 sps:$4 sm:$0xff]  }
  0x8f   :  { %930 = vmatprep.subr.bf16.mxu1 %v1302_v0  ;;  %v1371_v0 = vld [vmem:[#allocation5 + $0x20c] ss:$16 sps:$4 sm:$0xff]  }
  0x95   :  { %890 = vmatpush2.bf16.xpose.msra.mxu0 %v1304_v1  ;;  %v1366_v1 = vld [vmem:[#allocation5 + $0x200] ss:$16 sps:$4 sm:$0xff]  }
  0x96   :  { %931 = vmatpush2.bf16.xpose.msra.mxu1 %v1305_v2  ;;  %891 = vmatprep.subr.bf16.mxu0 %v1306_v3  ;;  %v1369_v2 = vld [vmem:[#allocation5 + $0x208] ss:$16 sps:$4 sm:$0xff]   ;;  %v1374_v3 = vld [vmem:[#allocation5 + $0x3e4] ss:$16 sps:$4 sm:$0xff]  }
  0x97   :  { %932 = vmatprep.subr.bf16.mxu1 %v1308_v4  ;;  %v1377_v4 = vld [vmem:[#allocation5 + $0x3ec] ss:$16 sps:$4 sm:$0xff]  }
  0x9d   :  { %892 = vmatpush2.bf16.xpose.msra.mxu0 %v1310_v5  ;;  %v1372_v5 = vld [vmem:[#allocation5 + $0x3e0] ss:$16 sps:$4 sm:$0xff]  }
  0x9e   :  { %933 = vmatpush2.bf16.xpose.msra.mxu1 %v1311_v6  ;;  %893 = vmatprep.subr.bf16.mxu0 %v1312_v7  ;;  %v1375_v6 = vld [vmem:[#allocation5 + $0x3e8] ss:$16 sps:$4 sm:$0xff]   ;;  %v1380_v7 = vld [vmem:[#allocation5 + $0x3c4] ss:$16 sps:$4 sm:$0xff]  }
  0x9f   :  { %934 = vmatprep.subr.bf16.mxu1 %v1314_v12  ;;  %v1383_v12 = vld [vmem:[#allocation5 + $0x3cc] ss:$16 sps:$4 sm:$0xff]  }
  0xa5   :  { %894 = vmatpush2.bf16.xpose.msra.mxu0 %v1316_v13  ;;  %v1378_v13 = vld [vmem:[#allocation5 + $0x3c0] ss:$16 sps:$4 sm:$0xff]  }
  0xa6   :  { %935 = vmatpush2.bf16.xpose.msra.mxu1 %v1317_v14  ;;  %895 = vmatprep.subr.bf16.mxu0 %v1318_v15  ;;  %v1381_v14 = vld [vmem:[#allocation5 + $0x3c8] ss:$16 sps:$4 sm:$0xff]   ;;  %v1386_v15 = vld [vmem:[#allocation5 + $0x3a4] ss:$16 sps:$4 sm:$0xff]  }
  0xa7   :  { %936 = vmatprep.subr.bf16.mxu1 %v1320_v16  ;;  %v1389_v16 = vld [vmem:[#allocation5 + $0x3ac] ss:$16 sps:$4 sm:$0xff]  }
  0xad   :  { %896 = vmatpush2.bf16.xpose.msra.mxu0 %v1322_v17  ;;  %v1384_v17 = vld [vmem:[#allocation5 + $0x3a0] ss:$16 sps:$4 sm:$0xff]  }
  0xae   :  { %937 = vmatpush2.bf16.xpose.msra.mxu1 %v1323_v18  ;;  %947 = vmatprep.subr.bf16.mxu0 %v1326_v19  ;;  %v1387_v18 = vld [vmem:[#allocation5 + $0x3a8] ss:$16 sps:$4 sm:$0xff]   ;;  %v1392_v19 = vld [vmem:[#allocation5 + $0x384] ss:$16 sps:$4 sm:$0xff]  }
  0xaf   :  { %988 = vmatprep.subr.bf16.mxu1 %v1329_v20  ;;  %v1395_v20 = vld [vmem:[#allocation5 + $0x38c] ss:$16 sps:$4 sm:$0xff]  }
  0xb4   :  { %898 = vmatmul.mubr.bf16.vlgmr.msra.gmra.mxu0 %v1600_v23 }
  0xb5   :  { %939 = vmatmul.mubr.bf16.vlgmr.msra.gmra.mxu1 %v1602_v24  ;;  %948 = vmatpush1.bf16.xpose.msra.mxu0 %v1324_v25  ;;  %v1398_v25 = vld [vmem:[#allocation5 + $0x364] ss:$16 sps:$4 sm:$0xff]  }
  0xb6   :  { %989 = vmatpush1.bf16.xpose.msra.mxu1 %v1327_v26  ;;  %949 = vmatprep.subr.bf16.mxu0 %v1332_v27  ;;  %v1401_v26 = vld [vmem:[#allocation5 + $0x36c] ss:$16 sps:$4 sm:$0xff]   ;;  %v1396_v27 = vld [vmem:[#allocation5 + $0x360] ss:$16 sps:$4 sm:$0xff]  }
  0xb7   :  { %990 = vmatprep.subr.bf16.mxu1 %v1335_v28  ;;  %979 = vmatprep.mubr.bf16.mxu0 %v1594_v39  ;;  %v1399_v28 = vld [vmem:[#allocation5 + $0x368] ss:$16 sps:$4 sm:$0xff]  }
  0xb8   :  { %1020 = vmatprep.mubr.bf16.mxu1 %v1596_v40 }
  0xbd   :  { %950 = vmatpush1.bf16.xpose.msra.mxu0 %v1330_v29  ;;  %v1404_v29 = vld [vmem:[#allocation5 + $0x344] ss:$16 sps:$4 sm:$0xff]  }
  0xbe   :  { %991 = vmatpush1.bf16.xpose.msra.mxu1 %v1333_v30  ;;  %951 = vmatprep.subr.bf16.mxu0 %v1338_v31  ;;  %v1407_v30 = vld [vmem:[#allocation5 + $0x34c] ss:$16 sps:$4 sm:$0xff]   ;;  %v1402_v31 = vld [vmem:[#allocation5 + $0x340] ss:$16 sps:$4 sm:$0xff]  }
  0xbf   :  { %992 = vmatprep.subr.bf16.mxu1 %v1341_v32  ;;  %v1405_v32 = vld [vmem:[#allocation5 + $0x348] ss:$16 sps:$4 sm:$0xff]  }
  0xc5   :  { %952 = vmatpush1.bf16.xpose.msra.mxu0 %v1336_v33  ;;  %v1410_v33 = vld [vmem:[#allocation5 + $0x324] ss:$16 sps:$4 sm:$0xff]  }
  0xc6   :  { %v1041_v37 = vpop.xlane.xlu0 %1040  ;;  %993 = vmatpush1.bf16.xpose.msra.mxu1 %v1339_v34  ;;  %953 = vmatprep.subr.bf16.mxu0 %v1344_v35  ;;  %v1413_v34 = vld [vmem:[#allocation5 + $0x32c] ss:$16 sps:$4 sm:$0xff]   ;;  %v1408_v35 = vld [vmem:[#allocation5 + $0x320] ss:$16 sps:$4 sm:$0xff]  }
  0xc7   :  { %v1042_v38 = vsub.f32 %v1582_v8, %v1041_v37  ;;  %v1043_v41 = vsub.f32 %v1584_v9, %v1041_v37  ;;  %v1044_v39 = vsub.f32 %v1586_v10, %v1041_v37  ;;  %v1045_v40 = vsub.f32 %v1588_v11, %v1041_v37  ;;  %994 = vmatprep.subr.bf16.mxu1 %v1347_v36  ;;  %v1353_v8 = vld [vmem:[#allocation5 + $0x26c] ss:$16 sps:$4 sm:$0xff]   ;;  %v1348_v9 = vld [vmem:[#allocation5 + $0x260] ss:$16 sps:$4 sm:$0xff]   ;;  %v1351_v10 = vld [vmem:[#allocation5 + $0x268] ss:$16 sps:$4 sm:$0xff]  }
  0xc8   :  { %v1356_v11 = vld [vmem:[#allocation5 + $0x244] ss:$16 sps:$4 sm:$0xff]   ;;  %v1411_v36 = vld [vmem:[#allocation5 + $0x328] ss:$16 sps:$4 sm:$0xff]  }
  0xc9   :  { %v1046_v42 = vmul.f32 1.442695, %v1042_v38  ;;  %v1048_v43 = vmul.f32 1.442695, %v1043_v41  ;;  %v1050_v44 = vmul.f32 1.442695, %v1044_v39 }
  0xca   :  { %v1052_v45 = vmul.f32 1.442695, %v1045_v40  ;;  %v1416_v37 = vld [vmem:[#allocation5 + $0x304] ss:$16 sps:$4 sm:$0xff]   ;;  %v1419_v38 = vld [vmem:[#allocation5 + $0x30c] ss:$16 sps:$4 sm:$0xff]   ;;  %v205_v40 = vlaneseq }
  0xcb   :  { %1420 = vpow2.f32 %v1046_v42  ;;  %v1414_v41 = vld [vmem:[#allocation5 + $0x300] ss:$16 sps:$4 sm:$0xff]   ;;  %v1417_v39 = vld [vmem:[#allocation5 + $0x308] ss:$16 sps:$4 sm:$0xff]  }
  0xcc   :  { %1422 = vpow2.f32 %v1048_v43  ;;  %v206_v43 = vshrl.u32 %v205_v40, 7 }
  0xcd   :  { %1424 = vpow2.f32 %v1050_v44  ;;  %954 = vmatpush1.bf16.xpose.msra.mxu0 %v1342_v46 }
  0xce   :  { %1426 = vpow2.f32 %v1052_v45  ;;  %995 = vmatpush1.bf16.xpose.msra.mxu1 %v1345_v47  ;;  %955 = vmatprep.subr.bf16.mxu0 %v1350_v48  ;;  %v207_v44 = vsub.s32 0, %v206_v43  ;;  %v203_v45 = vld [vmem:[#allocation7] sm:$0xf]  ;;  %v211_v46 = vsub.s32 1, %v206_v43 }
  0xcf   :  { %996 = vmatprep.subr.bf16.mxu1 %v1353_v8 }
  0xd0   :  { %v208_v47 = vrot.slane %v203_v45, %v207_v44  ;;  %v212_v48 = vrot.slane %v203_v45, %v211_v46 }
  0xd5   :  { %956 = vmatpush1.bf16.xpose.msra.mxu0 %v1348_v9 }
  0xd6   :  { %997 = vmatpush1.bf16.xpose.msra.mxu1 %v1351_v10  ;;  %957 = vmatprep.subr.bf16.mxu0 %v1356_v11 }
  0xd7   :  { %998 = vmatprep.subr.bf16.mxu1 %v1359_v49 }
  0xd8   :  { %v1612_v50 = vpop.eup %1420 }
  0xd9   :  { %v1614_v51 = vpop.eup %1422 }
  0xda   :  { %v1616_v52 = vpop.eup %1424  ;;  %v1054_v53 = vadd.f32 %v1614_v51, %v1612_v50 }
  0xdb   :  { %v1620_v54 = vpop.eup %1426 }
  0xdc   :  { %v1055_v56 = vadd.f32 %v1616_v52, %v1054_v53 }
  0xdd   :  { %958 = vmatpush1.bf16.xpose.msra.mxu0 %v1354_v55 }
  0xde   :  { %v1056_v60 = vadd.f32 %v1620_v54, %v1055_v56  ;;  %999 = vmatpush1.bf16.xpose.msra.mxu1 %v1357_v57  ;;  %959 = vmatprep.subr.bf16.mxu0 %v1362_v58 }
  0xdf   :  { %1000 = vmatprep.subr.bf16.mxu1 %v1365_v59 }
  0xe0   :  { %1057 = vadd.xlane.f32.xlu0 %v1056_v60 }
  0xe5   :  { %960 = vmatpush1.bf16.xpose.msra.mxu0 %v1360_v61 }
  0xe6   :  { %1001 = vmatpush1.bf16.xpose.msra.mxu1 %v1363_v62  ;;  %961 = vmatprep.subr.bf16.mxu0 %v1368_v63 }
  0xe7   :  { %1002 = vmatprep.subr.bf16.mxu1 %v1371_v0 }
  0xed   :  { %962 = vmatpush1.bf16.xpose.msra.mxu0 %v1366_v1 }
  0xee   :  { %1003 = vmatpush1.bf16.xpose.msra.mxu1 %v1369_v2  ;;  %963 = vmatprep.subr.bf16.mxu0 %v1374_v3  ;;  %v215_v2 = vsub.s32 2, %v206_v43  ;;  %v219_v3 = vsub.s32 3, %v206_v43 }
  0xef   :  { %1004 = vmatprep.subr.bf16.mxu1 %v1377_v4 }
  0xf5   :  { %964 = vmatpush2.bf16.xpose.msra.mxu0 %v1372_v5  ;;  %v220_v5 = vrot.slane %v203_v45, %v219_v3 }
  0xf6   :  { %1005 = vmatpush2.bf16.xpose.msra.mxu1 %v1375_v6  ;;  %965 = vmatprep.subr.bf16.mxu0 %v1380_v7 }
  0xf7   :  { %1006 = vmatprep.subr.bf16.mxu1 %v1383_v12 }
  0xfd   :  { %966 = vmatpush2.bf16.xpose.msra.mxu0 %v1378_v13 }
  0xfe   :  { %1007 = vmatpush2.bf16.xpose.msra.mxu1 %v1381_v14  ;;  %967 = vmatprep.subr.bf16.mxu0 %v1386_v15 }
  0xff   :  { %1008 = vmatprep.subr.bf16.mxu1 %v1389_v16 }
 0x105   :  { %968 = vmatpush2.bf16.xpose.msra.mxu0 %v1384_v17 }
 0x106   :  { %1009 = vmatpush2.bf16.xpose.msra.mxu1 %v1387_v18  ;;  %969 = vmatprep.subr.bf16.mxu0 %v1392_v19 }
 0x107   :  { %1010 = vmatprep.subr.bf16.mxu1 %v1395_v20 }
 0x10d   :  { %970 = vmatpush2.bf16.xpose.msra.mxu0 %v1390_v21 }
 0x10e   :  { %1011 = vmatpush2.bf16.xpose.msra.mxu1 %v1393_v22  ;;  %971 = vmatprep.subr.bf16.mxu0 %v1398_v25 }
 0x10f   :  { %1012 = vmatprep.subr.bf16.mxu1 %v1401_v26 }
 0x115   :  { %972 = vmatpush2.bf16.xpose.msra.mxu0 %v1396_v27 }
 0x116   :  { %1013 = vmatpush2.bf16.xpose.msra.mxu1 %v1399_v28  ;;  %973 = vmatprep.subr.bf16.mxu0 %v1404_v29 }
 0x117   :  { %1014 = vmatprep.subr.bf16.mxu1 %v1407_v30 }
 0x11d   :  { %974 = vmatpush2.bf16.xpose.msra.mxu0 %v1402_v31 }
 0x11e   :  { %1015 = vmatpush2.bf16.xpose.msra.mxu1 %v1405_v32  ;;  %975 = vmatprep.subr.bf16.mxu0 %v1410_v33 }
 0x11f   :  { %1016 = vmatprep.subr.bf16.mxu1 %v1413_v34 }
 0x125   :  { %976 = vmatpush2.bf16.xpose.msra.mxu0 %v1408_v35 }
 0x126   :  { %1017 = vmatpush2.bf16.xpose.msra.mxu1 %v1411_v36  ;;  %977 = vmatprep.subr.bf16.mxu0 %v1416_v37 }
 0x127   :  { %1018 = vmatprep.subr.bf16.mxu1 %v1419_v38 }
 0x12d   :  { %978 = vmatpush2.bf16.xpose.msra.mxu0 %v1414_v41 }
 0x12e   :  { %1019 = vmatpush2.bf16.xpose.msra.mxu1 %v1417_v39 }
 0x134   :  { %980 = vmatmul.mubr.bf16.vlgmr.msra.gmra.mxu0 %v1600_v23 }
 0x135   :  { %1021 = vmatmul.mubr.bf16.vlgmr.msra.gmra.mxu1 %v1602_v24 }
 0x169   :  { %v1058_v42 = vpop.xlane.xlu0 %1057 }
 0x16a   :  { %1428 = vrcp.f32 %v1058_v42 }
 0x174   :  { %v899_v8 = vpop.f32.mrf.mxu0 }
 0x175   :  { %v940_v9 = vpop.f32.mrf.mxu1  ;;  %v900_v11 = vadd.f32 %v899_v8, %v208_v47 }
 0x176   :  { %v901_v53 = vpop.f32.mrf.mxu0 }
 0x177   :  { %v1429_v10 = vpop.eup %1428  ;;  %v942_v55 = vpop.f32.mrf.mxu1  ;;  %v941_v24 = vadd.f32 %v940_v9, %v900_v11  ;;  %v902_v56 = vadd.f32 %v901_v53, %v212_v48 }
 0x178   :  { %v1060_v49 = vmul.f32 %v1429_v10, %v1612_v50  ;;  %v1061_v23 = vmul.f32 %v1429_v10, %v1614_v51  ;;  %v903_v58 = vpop.f32.mrf.mxu0  ;;  %v216_v50 = vrot.slane %v203_v45, %v215_v2  ;;  %v1062_v4 = vmul.f32 %v1429_v10, %v1616_v52 }
 0x179   :  { %v944_v59 = vpop.f32.mrf.mxu1  ;;  %v943_v60 = vadd.f32 %v942_v55, %v902_v56  ;;  %v1063_v12 = vmul.f32 %v1429_v10, %v1620_v54 }
 0x17a   :  { %v1064_v57 = vadd.f32 1.0, %v1060_v49  ;;  %v1065_v61 = vadd.f32 1.0, %v1061_v23  ;;  %v904_v63 = vpop.f32.mrf.mxu0  ;;  %v1066_v15 = vadd.f32 1.0, %v1062_v4 }
 0x17b   :  { %v945_v0 = vpop.f32.mrf.mxu1  ;;  %v1067_v21 = vadd.f32 1.0, %v1063_v12 }
 0x17c   :  { %v1068_v62 = vmul.f32 %v1064_v57, %v941_v24  ;;  %v1069_v1 = vmul.f32 %v1065_v61, %v943_v60 }
 0x17e   :  { %1072 = vst [vmem:[#allocation10] sm:$0xff] %v1068_v62  ;;  %1073 = vst [vmem:[#allocation10 + $0x8] sm:$0xff] %v1069_v1 }
 0x1f4   :  { %v981_v51 = vpop.f32.mrf.mxu0 }
 0x1f5   :  { %v982_v6 = vadd.f32 %v981_v51, %v216_v50  ;;  %v1022_v7 = vpop.f32.mrf.mxu1 }
 0x1f6   :  { %v983_v13 = vpop.f32.mrf.mxu0 }
 0x1f7   :  { %v1023_v14 = vadd.f32 %v1022_v7, %v982_v6  ;;  %v984_v16 = vadd.f32 %v983_v13, %v220_v5  ;;  %v1024_v17 = vpop.f32.mrf.mxu1 }
 0x1f8   :  { %v985_v18 = vpop.f32.mrf.mxu0 }
 0x1f9   :  { %v1070_v19 = vmul.f32 %v1066_v15, %v1023_v14  ;;  %v1025_v20 = vadd.f32 %v1024_v17, %v984_v16  ;;  %v1026_v22 = vpop.f32.mrf.mxu1 }
 0x1fa   :  { %v986_v25 = vpop.f32.mrf.mxu0 }
 0x1fb   :  { %1074 = vst [vmem:[#allocation10 + $0x10] sm:$0xff] %v1070_v19  ;;  %v1071_v52 = vmul.f32 %v1067_v21, %v1025_v20  ;;  %v1027_v26 = vpop.f32.mrf.mxu1 }
 0x1fd   :  { %1075 = vst [vmem:[#allocation10 + $0x18] sm:$0xff] %v1071_v52 }
 0x1fe   :  { %1521 = shalt.err (!%p1518_p10)
}
 0x1ff   :  { %1085 = dma.vmem_to_hbm [thread:$0]  %s1083_s3, 512, %s1637_s4, [#allocation4]  }
 0x200   :  { %1536 = dma.done.wait [#allocation4], 512  }
 0x201   :  { %1537 = vsyncadd [#allocation4], 4294966784 }
 0x202   :  { %1089 = vsyncpa [#allocation3], 1 }
 0x203   :  { %1090 = vsyncpa [#allocation6], 1 }
 0x204   :  { %1091 = vsyncpa [#allocation9], 1 }
 0x205   :  { %1092 = vsyncpa [#allocation4], 1 }

</bundles_post_ra>
